<compile_context>
chip_gen: v6e
topology: v6e:2x2x1
jax: 0.10.0
libtpu: 0.0.40
codegen_flags: <defaults>
</compile_context>

<pallas_src>
import jax
import jax.numpy as jnp
from jax.experimental import pallas as pl
from jax.experimental.pallas import tpu as pltpu

_LANES = 128
# 2048 rows * 128 lanes * 4 B = 1 MiB per f32 input buffer; 2 inputs, double-buffered
# -> ~4 MiB VMEM.  Comfortably under the scoped defaults on v5e (16 MiB), v6e (32 MiB)
# and v7x (32 MiB scoped / 64 MiB physical).
_MAX_TILE_ROWS = 2048


def _cdiv(a, b):
    return -(-a // b)


def _pick_tile_rows(rows):
    """Largest sublane-aligned tile that fits comfortably in VMEM, while keeping
    enough grid steps on large inputs for cross-TensorCore load balance."""
    if rows <= 8:
        return rows                       # block == full array (tiny input)
    if rows < 16:
        return 8
    tile_r = min(_MAX_TILE_ROWS, (rows // 16) * 16)
    # Keep >= ~8 grid steps when the input is big enough, but never drop below the
    # measured ~85%-of-roofline tile size (512 rows).
    while tile_r > 512 and _cdiv(rows, tile_r) < 8:
        tile_r = max(512, ((tile_r // 2) // 16) * 16)
    return tile_r


def _accumulate(p, t, out_ref, binary_targets):
    """p, t: (tile_r, 128) f32 tiles.  Writes one lane-dense (8, 128) block of
    per-lane partial sums: row0 = sum(-bce_elem), row1 = sum(p*t),
    row2 = sum(p), row3 = sum(t)."""
    if binary_targets:
        # Hard {0,1} targets: one log instead of two (halves EUP pushes, fewer VALU ops).
        x = jnp.where(t >= 0.5, p, 1.0 - p)
        nbce = jnp.maximum(jnp.log(x), -100.0)              # == -bce_elem
    else:
        # torch-style -100 clamp; also makes masked/zeroed (p, t) contribute exactly 0.
        log_p = jnp.maximum(jnp.log(p), -100.0)
        log_1mp = jnp.maximum(jnp.log(1.0 - p), -100.0)
        nbce = log_1mp + t * (log_p - log_1mp)               # == -bce_elem (fewer VALU ops)

    # Reduce over the sublane (row) axis only -> lane-dense (1, 128) partials.
    s_nbce = jnp.sum(nbce, axis=0, keepdims=True)
    s_pt = jnp.sum(p * t, axis=0, keepdims=True)
    s_p = jnp.sum(p, axis=0, keepdims=True)
    s_t = jnp.sum(t, axis=0, keepdims=True)

    # Pack the four partial-sum rows into one unmasked (8, 128) store.
    row = jax.lax.broadcasted_iota(jnp.int32, (8, _LANES), 0)
    partial = (jnp.where(row == 0, s_nbce, 0.0)
               + jnp.where(row == 1, s_pt, 0.0)
               + jnp.where(row == 2, s_p, 0.0)
               + jnp.where(row == 3, s_t, 0.0))
    out_ref[0] = partial


def _make_kernel(rows, tile_r, binary_targets):
    needs_mask = (rows % tile_r) != 0

    def kernel(p_ref, t_ref, out_ref):
        # Inputs arrive in their native dtype; cast after the load so HBM traffic
        # stays narrow (bf16 / int8 targets supported without any host-side cast).
        if not needs_mask:
            _accumulate(p_ref[...].astype(jnp.float32),
                        t_ref[...].astype(jnp.float32),
                        out_ref, binary_targets)
            return

        rows_left = rows - pl.program_id(0) * tile_r

        @pl.when(rows_left >= tile_r)
        def _full_tile():
            _accumulate(p_ref[...].astype(jnp.float32),
                        t_ref[...].astype(jnp.float32),
                        out_ref, binary_targets)

        @pl.when(rows_left < tile_r)
        def _ragged_tile():
            # Only the final tile pays for the mask; zeroed rows contribute exactly 0
            # to every partial sum (the -100 log clamp keeps 0*log(0) finite).
            r = jax.lax.broadcasted_iota(jnp.int32, (tile_r, _LANES), 0)
            valid = r < rows_left
            p = jnp.where(valid, p_ref[...].astype(jnp.float32), 0.0)
            t = jnp.where(valid, t_ref[...].astype(jnp.float32), 0.0)
            _accumulate(p, t, out_ref, binary_targets)

    return kernel


def focal_bce_focal_tversky_balance_loss(inputs, targets, *, binary_targets=False):
    """JAX/Pallas equivalent of FocalBCEFocalTverskyBalanceLoss.forward for the
    input.dim() == target.dim() path (inputs already sigmoid-normalized).

    Set binary_targets=True only for hard {0,1} labels (single-log fast path);
    the default path matches the PyTorch reference for soft targets as well."""
    assert inputs.shape == targets.shape, "'input' and 'target' must have the same shape"
    # TODO(synk): the target.dim() != input.dim() branch (focal_weight relabelling +
    # expand_as_one_hot when a matching `mask` is supplied) is not implemented.
    # TODO(synk): verify via xprof that Mosaic shards the 1-D parallel grid across
    # both TensorCores on v7x; if not, restructure to grid=(2, num_tiles//2).

    n_elems = int(inputs.size)
    p_flat = inputs.reshape(-1)
    t_flat = targets.reshape(-1)          # native dtype; cast happens in-kernel

    rows = n_elems // _LANES
    tail = n_elems - rows * _LANES

    if rows > 0:
        tile_r = _pick_tile_rows(rows)
        num_tiles = _cdiv(rows, tile_r)
        n_main = rows * _LANES
        # Lane-aligned prefix; a free reshape when n_elems % 128 == 0 (common case).
        p2 = (p_flat if tail == 0 else p_flat[:n_main]).reshape(rows, _LANES)
        t2 = (t_flat if tail == 0 else t_flat[:n_main]).reshape(rows, _LANES)

        cost = pl.CostEstimate(
            flops=8 * n_main,
            transcendentals=(1 if binary_targets else 2) * n_main,
            bytes_accessed=n_main * (p2.dtype.itemsize + t2.dtype.itemsize)
            + num_tiles * 8 * _LANES * 4,
        )

        partials = pl.pallas_call(
            _make_kernel(rows, tile_r, binary_targets),
            out_shape=jax.ShapeDtypeStruct((num_tiles, 8, _LANES), jnp.float32),
            grid=(num_tiles,),
            in_specs=[
                pl.BlockSpec((tile_r, _LANES), lambda i: (i, 0)),
                pl.BlockSpec((tile_r, _LANES), lambda i: (i, 0)),
            ],
            out_specs=pl.BlockSpec((1, 8, _LANES), lambda i: (i, 0, 0)),
            compiler_params=pltpu.CompilerParams(dimension_semantics=("parallel",)),
            cost_estimate=cost,
        )(p2, t2)

        sums = jnp.sum(partials, axis=(0, 2))   # (8,) f32; rows 4..7 are zero
        nbce_sum, sum_pt, sum_p, sum_t = sums[0], sums[1], sums[2], sums[3]
    else:
        nbce_sum = sum_pt = sum_p = sum_t = jnp.float32(0.0)

    if tail:
        # < 128 trailing elements: fold in with plain JAX (negligible) instead of
        # padding / copying the full tensors on the host side.
        pt_ = p_flat[n_elems - tail:].astype(jnp.float32)
        tt_ = t_flat[n_elems - tail:].astype(jnp.float32)
        log_p = jnp.maximum(jnp.log(pt_), -100.0)
        log_1mp = jnp.maximum(jnp.log(1.0 - pt_), -100.0)
        nbce_sum = nbce_sum + jnp.sum(log_1mp + tt_ * (log_p - log_1mp))
        sum_pt = sum_pt + jnp.sum(pt_ * tt_)
        sum_p = sum_p + jnp.sum(pt_)
        sum_t = sum_t + jnp.sum(tt_)

    # Tiny scalar epilogue (closed-form combine of the four global sums).
    n = jnp.float32(n_elems)
    bce = -nbce_sum / n
    focal_bce = 0.8 * (1.0 - jnp.exp(-bce)) ** 2 * bce

    tp = sum_pt
    fp = sum_p - tp
    fn = sum_t - tp
    smooth = 1.0
    tversky = (tp + smooth) / (tp + 0.5 * fp + 0.5 * fn + smooth)
    focal_tversky = (1.0 - tversky) ** 1.0

    return focal_bce + focal_tversky


def _reference_loss(inputs, targets):
    """Plain-JAX reference of the PyTorch forward (same-dims path)."""
    p = inputs.reshape(-1).astype(jnp.float32)
    t = targets.reshape(-1).astype(jnp.float32)
    log_p = jnp.maximum(jnp.log(p), -100.0)
    log_1mp = jnp.maximum(jnp.log(1.0 - p), -100.0)
    bce = jnp.mean(-(t * log_p + (1.0 - t) * log_1mp))
    focal_bce = 0.8 * (1.0 - jnp.exp(-bce)) ** 2 * bce
    tp = jnp.sum(p * t)
    fp = jnp.sum((1.0 - t) * p)
    fn = jnp.sum(t * (1.0 - p))
    tversky = (tp + 1.0) / (tp + 0.5 * fp + 0.5 * fn + 1.0)
    return focal_bce + (1.0 - tversky)


if __name__ == "__main__":
    key = jax.random.PRNGKey(0)
    k1, k2, k3, k4 = jax.random.split(key, 4)

    # (N, C, H, W) segmentation-style probabilities and hard binary targets.
    B, C, H, W = 2, 4, 16, 16
    inp = jax.nn.sigmoid(jax.random.normal(k1, (B, C, H, W), dtype=jnp.float32))
    tgt = (jax.random.uniform(k2, (B, C, H, W)) > 0.5).astype(jnp.float32)

    loss = focal_bce_focal_tversky_balance_loss(inp, tgt)
    jax.block_until_ready(loss)
    ref = _reference_loss(inp, tgt)
    assert jnp.allclose(loss, ref, atol=1e-5, rtol=1e-5), (loss, ref)

    # Flag-gated binary-target fast path (single log) on the same hard labels.
    loss_bin = focal_bce_focal_tversky_balance_loss(inp, tgt, binary_targets=True)
    jax.block_until_ready(loss_bin)
    assert jnp.allclose(loss_bin, ref, atol=1e-5, rtol=1e-5), (loss_bin, ref)

    # Ragged shape with soft targets: 3*5*8*31 = 3720 = 29*128 + 8 exercises the
    # in-kernel row mask (last partial tile) and the <128-element tail path.
    inp2 = jax.nn.sigmoid(jax.random.normal(k3, (3, 5, 8, 31), dtype=jnp.float32))
    tgt2 = jax.random.uniform(k4, (3, 5, 8, 31), dtype=jnp.float32)
    loss2 = focal_bce_focal_tversky_balance_loss(inp2, tgt2)
    jax.block_until_ready(loss2)
    ref2 = _reference_loss(inp2, tgt2)
    assert jnp.allclose(loss2, ref2, atol=1e-5, rtol=1e-5), (loss2, ref2)

    print("KERNEL_OK")
</pallas_src>

<mosaic_0001>
module attributes {stable_mosaic.version = 11 : i64} {
  func.func @kernel(%arg0: i32, %arg1: memref<16x128xf32, #tpu.memory_space<vmem>>, %arg2: memref<16x128xf32, #tpu.memory_space<vmem>>, %arg3: memref<1x8x128xf32, #tpu.memory_space<vmem>>) attributes {dimension_semantics = [#tpu.dimension_semantics<parallel>], iteration_bounds = array<i64: 1>, scalar_prefetch = 0 : i64, scratch_operands = 0 : i64, tpu.core_type = #tpu.core_type<tc>, window_params = [{transform_indices = @transform_0, window_bounds = array<i64: 16, 128>}, {transform_indices = @transform_1, window_bounds = array<i64: 16, 128>}, {transform_indices = @transform_2, window_bounds = array<i64: 1, 8, 128>}]} {
    %c0 = arith.constant 0 : index
    %c0_0 = arith.constant 0 : index
    %0 = vector.load %arg1[%c0, %c0_0] : memref<16x128xf32, #tpu.memory_space<vmem>>, vector<16x128xf32>
    %c0_1 = arith.constant 0 : index
    %c0_2 = arith.constant 0 : index
    %1 = vector.load %arg2[%c0_1, %c0_2] : memref<16x128xf32, #tpu.memory_space<vmem>>, vector<16x128xf32>
    %2 = math.log %0 : vector<16x128xf32>
    %cst = arith.constant -1.000000e+02 : f32
    %3 = vector.broadcast %cst : f32 to vector<16x128xf32>
    %4 = arith.maximumf %2, %3 : vector<16x128xf32>
    %cst_3 = arith.constant 1.000000e+00 : f32
    %5 = vector.broadcast %cst_3 : f32 to vector<16x128xf32>
    %6 = arith.subf %5, %0 : vector<16x128xf32>
    %7 = math.log %6 : vector<16x128xf32>
    %cst_4 = arith.constant -1.000000e+02 : f32
    %8 = vector.broadcast %cst_4 : f32 to vector<16x128xf32>
    %9 = arith.maximumf %7, %8 : vector<16x128xf32>
    %10 = arith.subf %4, %9 : vector<16x128xf32>
    %11 = arith.mulf %1, %10 : vector<16x128xf32>
    %12 = arith.addf %9, %11 : vector<16x128xf32>
    %cst_5 = arith.constant dense<0.000000e+00> : vector<128xf32>
    %13 = vector.multi_reduction <add>, %12, %cst_5 [0] : vector<16x128xf32> to vector<128xf32>
    %14 = vector.shape_cast %13 : vector<128xf32> to vector<1x128xf32>
    %15 = arith.mulf %0, %1 : vector<16x128xf32>
    %cst_6 = arith.constant dense<0.000000e+00> : vector<128xf32>
    %16 = vector.multi_reduction <add>, %15, %cst_6 [0] : vector<16x128xf32> to vector<128xf32>
    %17 = vector.shape_cast %16 : vector<128xf32> to vector<1x128xf32>
    %cst_7 = arith.constant dense<0.000000e+00> : vector<128xf32>
    %18 = vector.multi_reduction <add>, %0, %cst_7 [0] : vector<16x128xf32> to vector<128xf32>
    %19 = vector.shape_cast %18 : vector<128xf32> to vector<1x128xf32>
    %cst_8 = arith.constant dense<0.000000e+00> : vector<128xf32>
    %20 = vector.multi_reduction <add>, %1, %cst_8 [0] : vector<16x128xf32> to vector<128xf32>
    %21 = vector.shape_cast %20 : vector<128xf32> to vector<1x128xf32>
    %22 = tpu.iota {dimensions = array<i32: 0>} : vector<8x128xi32>
    %c0_i32 = arith.constant 0 : i32
    %23 = vector.broadcast %c0_i32 : i32 to vector<8x128xi32>
    %24 = arith.cmpi eq, %22, %23 : vector<8x128xi32>
    %cst_9 = arith.constant 0.000000e+00 : f32
    %25 = vector.shape_cast %14 : vector<1x128xf32> to vector<1x128xf32>
    %26 = vector.broadcast %25 : vector<1x128xf32> to vector<8x128xf32>
    %27 = vector.broadcast %cst_9 : f32 to vector<8x128xf32>
    %28 = arith.select %24, %26, %27 : vector<8x128xi1>, vector<8x128xf32>
    %c1_i32 = arith.constant 1 : i32
    %29 = vector.broadcast %c1_i32 : i32 to vector<8x128xi32>
    %30 = arith.cmpi eq, %22, %29 : vector<8x128xi32>
    %cst_10 = arith.constant 0.000000e+00 : f32
    %31 = vector.shape_cast %17 : vector<1x128xf32> to vector<1x128xf32>
    %32 = vector.broadcast %31 : vector<1x128xf32> to vector<8x128xf32>
    %33 = vector.broadcast %cst_10 : f32 to vector<8x128xf32>
    %34 = arith.select %30, %32, %33 : vector<8x128xi1>, vector<8x128xf32>
    %35 = arith.addf %28, %34 : vector<8x128xf32>
    %c2_i32 = arith.constant 2 : i32
    %36 = vector.broadcast %c2_i32 : i32 to vector<8x128xi32>
    %37 = arith.cmpi eq, %22, %36 : vector<8x128xi32>
    %cst_11 = arith.constant 0.000000e+00 : f32
    %38 = vector.shape_cast %19 : vector<1x128xf32> to vector<1x128xf32>
    %39 = vector.broadcast %38 : vector<1x128xf32> to vector<8x128xf32>
    %40 = vector.broadcast %cst_11 : f32 to vector<8x128xf32>
    %41 = arith.select %37, %39, %40 : vector<8x128xi1>, vector<8x128xf32>
    %42 = arith.addf %35, %41 : vector<8x128xf32>
    %c3_i32 = arith.constant 3 : i32
    %43 = vector.broadcast %c3_i32 : i32 to vector<8x128xi32>
    %44 = arith.cmpi eq, %22, %43 : vector<8x128xi32>
    %cst_12 = arith.constant 0.000000e+00 : f32
    %45 = vector.shape_cast %21 : vector<1x128xf32> to vector<1x128xf32>
    %46 = vector.broadcast %45 : vector<1x128xf32> to vector<8x128xf32>
    %47 = vector.broadcast %cst_12 : f32 to vector<8x128xf32>
    %48 = arith.select %44, %46, %47 : vector<8x128xi1>, vector<8x128xf32>
    %49 = arith.addf %42, %48 : vector<8x128xf32>
    %c0_13 = arith.constant 0 : index
    %c0_14 = arith.constant 0 : index
    %c0_15 = arith.constant 0 : index
    %50 = vector.load %arg3[%c0_13, %c0_14, %c0_15] : memref<1x8x128xf32, #tpu.memory_space<vmem>>, vector<1x8x128xf32>
    %51 = vector.shape_cast %50 : vector<1x8x128xf32> to vector<8x128xf32>
    %52 = vector.shape_cast %49 : vector<8x128xf32> to vector<1x8x128xf32>
    tpu.vector_store %arg3[%c0_13, %c0_14, %c0_15], %52 {strides = array<i32>} : memref<1x8x128xf32, #tpu.memory_space<vmem>>, vector<1x8x128xf32>,
    return
  }
  func.func @transform_0(%arg0: i32) -> (i32, i32) {
    %c0_i32 = arith.constant 0 : i32
    %c0_i32_0 = arith.constant 0 : i32
    return %arg0, %c0_i32 : i32, i32
  }
  func.func @transform_1(%arg0: i32) -> (i32, i32) {
    %c0_i32 = arith.constant 0 : i32
    %c0_i32_0 = arith.constant 0 : i32
    return %arg0, %c0_i32 : i32, i32
  }
  func.func @transform_2(%arg0: i32) -> (i32, i32, i32) {
    %c0_i32 = arith.constant 0 : i32
    %c0_i32_0 = arith.constant 0 : i32
    %c0_i32_1 = arith.constant 0 : i32
    return %arg0, %c0_i32, %c0_i32_0 : i32, i32, i32
  }
}

</mosaic_0001>

<bundles_post_ra>
// kernel: tpu_custom_call.1
= control target key start
LH: loop header
LB: loop body
LE: loop exit
PB: predicated region body
PF: predicated region fallthrough
CT: control target
= control target key end

     0   :  { %7 = vsyncpa [#allocation3], 0  ;;  %s232_s0 = inlined_call_operand.hbm [shape: f32[16,128], index: 0, kind: input, shape index: {}]   ;;  %s233_s1 = inlined_call_operand.hbm [shape: f32[16,128], index: 1, kind: input, shape index: {}]   ;;  %s234_s2 = inlined_call_operand.hbm [shape: f32[1,8,128], index: 2, kind: output, shape index: {}]  }
   0x1   :  { %8 = vsyncpa [#allocation6], 0 }
   0x2   :  { %9 = vsyncpa [#allocation4], 0  ;;  %s203_s9 = smov [#allocation2]  }
   0x3   :  { %s15_s10 = sshll.u32 %s203_s9, 4  ;;  %s16_s10 = int_to_ptr.vmem [resolvable:$true] %s15_s10 }
   0x4   :  { %s145_s11 = scalar_lea.vmem %s16_s10, 256  ;;  %p150_p1 = scmp.lt.s32.totalorder %s16_s10, %s16_s10 }
   0x5   :  { %p146_p0 = scmp.ne.s32.totalorder %s16_s10, %s145_s11  ;;  %p151_p2 = scmp.lt.s32.totalorder %s145_s11, %s145_s11 }
   0x7   :  { %p152_p3 = por %p151_p2, %p150_p1 }
   0x9   :  { %p153_p4 = pnand %p152_p3, %p146_p0 }
   0xb   :  { %156 = shalt.err (!%p153_p4)
}
   0xc   :  { %s204_s12 = smov 128   ;;  %s205_s13 = smov 8  }
   0xd   :  { %21 = dma.hbm_to_vmem [thread:$0]  %s232_s0, 256, %s16_s10, [#allocation3], %s204_s12, %s204_s12, %s205_s13  }
   0xe   :  { %s206_s16 = smov [#allocation5]  }
   0xf   :  { %s27_s17 = sshll.u32 %s206_s16, 4  ;;  %s28_s17 = int_to_ptr.vmem [resolvable:$true] %s27_s17 }
  0x10   :  { %s165_s18 = scalar_lea.vmem %s28_s17, 256  ;;  %p170_p6 = scmp.lt.s32.totalorder %s28_s17, %s28_s17 }
  0x11   :  { %p166_p5 = scmp.ne.s32.totalorder %s28_s17, %s165_s18  ;;  %p171_p7 = scmp.lt.s32.totalorder %s165_s18, %s165_s18 }
  0x13   :  { %p172_p8 = por %p171_p7, %p170_p6 }
  0x15   :  { %p173_p9 = pnand %p172_p8, %p166_p5 }
  0x17   :  { %176 = shalt.err (!%p173_p9)
}
  0x18   :  { %33 = dma.hbm_to_vmem [thread:$0]  %s233_s1, 256, %s28_s17, [#allocation6], %s204_s12, %s204_s12, %s205_s13  }
  0x19   :  { %197 = dma.done.wait [#allocation3], 256  }
  0x1a   :  { %198 = vsyncadd [#allocation3], 4294967040 }
  0x1b   :  { %199 = dma.done.wait [#allocation6], 256  }
  0x1c   :  { %200 = vsyncadd [#allocation6], 4294967040  ;;  %v40_v0 = vld [vmem:[#allocation2] sm:$0xff]  ;;  %v41_v1 = vld [vmem:[#allocation2 + $0x8] sm:$0xff]  ;;  %v94_v40 = vlaneseq  ;;  %s207_s0 = smov [#allocation7]  }
  0x1d   :  { %129 = vlog2.f32 %v40_v0  ;;  %v50_v2 = vsub.f32 1.0, %v40_v0  ;;  %v51_v3 = vsub.f32 1.0, %v41_v1  ;;  %v42_v4 = vld [vmem:[#allocation5] sm:$0xff]  ;;  %v43_v5 = vld [vmem:[#allocation5 + $0x8] sm:$0xff]  ;;  %v80_v10 = vadd.f32 %v41_v1, %v40_v0  ;;  %s114_s1 = sshll.u32 %s207_s0, 4  ;;  %s115_s1 = int_to_ptr.vmem [resolvable:$true] %s114_s1 }
  0x1e   :  { %131 = vlog2.f32 %v41_v1  ;;  %v71_v6 = vmul.f32 %v42_v4, %v40_v0  ;;  %v72_v7 = vmul.f32 %v43_v5, %v41_v1  ;;  %v87_v16 = vadd.f32 %v43_v5, %v42_v4  ;;  %s177_s21 = scalar_lea.vmem %s115_s1, 128  ;;  %p182_p11 = scmp.lt.s32.totalorder %s115_s1, %s115_s1 }
  0x1f   :  { %133 = vlog2.f32 %v50_v2  ;;  %v81_v22 = vrot.slane %v80_v10, 4  ;;  %v95_v46 = vshrl.u32 %v94_v40, 7  ;;  %p178_p10 = scmp.ne.s32.totalorder %s115_s1, %s177_s21  ;;  %p183_p12 = scmp.lt.s32.totalorder %s177_s21, %s177_s21 }
  0x20   :  { %135 = vlog2.f32 %v51_v3  ;;  %v73_v8 = vadd.f32 %v72_v7, %v71_v6  ;;  %v88_v26 = vrot.slane %v87_v16, 4 }
  0x21   :  { %v82_v29 = vadd.f32 %v81_v22, %v80_v10  ;;  %vm98_vm0 = vcmp.eq.s32.totalorder %v95_v46, 1  ;;  %vm96_vm1 = vcmp.eq.s32.totalorder %v95_v46, 0  ;;  %vm101_vm2 = vcmp.eq.s32.totalorder %v95_v46, 2  ;;  %p184_p13 = por %p183_p12, %p182_p11 }
  0x22   :  { %v74_v15 = vrot.slane %v73_v8, 4  ;;  %v89_v33 = vadd.f32 %v88_v26, %v87_v16  ;;  %vm104_vm3 = vcmp.eq.s32.totalorder %v95_v46, 3 }
  0x23   :  { %v83_v36 = vrot.slane %v82_v29, 2  ;;  %p185_p0 = pnand %p184_p13, %p178_p10 }
  0x24   :  { %v75_v25 = vadd.f32 %v74_v15, %v73_v8  ;;  %v90_v39 = vrot.slane %v89_v33, 2 }
  0x25   :  { %v84_v42 = vadd.f32 %v83_v36, %v82_v29 }
  0x26   :  { %v76_v32 = vrot.slane %v75_v25, 2  ;;  %v91_v45 = vadd.f32 %v90_v39, %v89_v33 }
  0x27   :  { %v85_v48 = vrot.slane %v84_v42, 1 }
  0x28   :  { %v77_v38 = vadd.f32 %v76_v32, %v75_v25  ;;  %v92_v51 = vrot.slane %v91_v45, 1 }
  0x29   :  { %v86_v53 = vadd.f32 %v85_v48, %v84_v42 }
  0x2a   :  { %v130_v9 = vpop.eup %129  ;;  %v78_v44 = vrot.slane %v77_v38, 1  ;;  %v93_v55 = vadd.f32 %v92_v51, %v91_v45 }
  0x2b   :  { %v132_v11 = vpop.eup %131  ;;  %v45_v12 = vmul.f32 0.6931472, %v130_v9  ;;  %v102_v58 = vsel %vm101_vm2, %v86_v53, 0.0 }
  0x2c   :  { %v134_v13 = vpop.eup %133  ;;  %v47_v14 = vmul.f32 0.6931472, %v132_v11  ;;  %v79_v50 = vadd.f32 %v78_v44, %v77_v38  ;;  %v105_v60 = vsel %vm104_vm3, %v93_v55, 0.0 }
  0x2d   :  { %v136_v17 = vpop.eup %135  ;;  %v48_v18 = vmax.f32 %v45_v12, -100.0  ;;  %v53_v19 = vmul.f32 0.6931472, %v134_v13 }
  0x2e   :  { %v49_v20 = vmax.f32 %v47_v14, -100.0  ;;  %v55_v21 = vmul.f32 0.6931472, %v136_v17  ;;  %v99_v56 = vsel %vm98_vm0, %v79_v50, 0.0 }
  0x2f   :  { %v56_v23 = vmax.f32 %v53_v19, -100.0 }
  0x30   :  { %v57_v24 = vmax.f32 %v55_v21, -100.0 }
  0x31   :  { %v58_v27 = vsub.f32 %v48_v18, %v56_v23 }
  0x32   :  { %v59_v28 = vsub.f32 %v49_v20, %v57_v24 }
  0x33   :  { %v60_v30 = vmul.f32 %v58_v27, %v42_v4 }
  0x34   :  { %v61_v31 = vmul.f32 %v59_v28, %v43_v5 }
  0x35   :  { %v62_v34 = vadd.f32 %v60_v30, %v56_v23 }
  0x36   :  { %v63_v35 = vadd.f32 %v61_v31, %v57_v24 }
  0x38   :  { %v64_v37 = vadd.f32 %v63_v35, %v62_v34 }
  0x3a   :  { %v65_v41 = vrot.slane %v64_v37, 4 }
  0x3c   :  { %v66_v43 = vadd.f32 %v65_v41, %v64_v37 }
  0x3e   :  { %v67_v47 = vrot.slane %v66_v43, 2 }
  0x40   :  { %v68_v49 = vadd.f32 %v67_v47, %v66_v43 }
  0x42   :  { %v69_v52 = vrot.slane %v68_v49, 1 }
  0x44   :  { %v70_v54 = vadd.f32 %v69_v52, %v68_v49 }
  0x46   :  { %v97_v57 = vsel %vm96_vm1, %v70_v54, 0.0 }
  0x47   :  { %v100_v59 = vadd.f32 %v99_v56, %v97_v57 }
  0x49   :  { %v103_v61 = vadd.f32 %v102_v58, %v100_v59 }
  0x4b   :  { %v106_v62 = vadd.f32 %v105_v60, %v103_v61 }
  0x4d   :  { %107 = vst [vmem:[#allocation7] sm:$0xff] %v106_v62 }
  0x4e   :  { %188 = shalt.err (!%p185_p0)
}
  0x4f   :  { %117 = dma.vmem_to_hbm [thread:$0]  %s115_s1, 128, %s234_s2, [#allocation4]  }
  0x50   :  { %201 = dma.done.wait [#allocation4], 128  }
  0x51   :  { %202 = vsyncadd [#allocation4], 4294967168 }
  0x52   :  { %121 = vsyncpa [#allocation3], 1 }
  0x53   :  { %122 = vsyncpa [#allocation6], 1 }
  0x54   :  { %123 = vsyncpa [#allocation4], 1 }

</bundles_post_ra>
